<compile_context>
chip_gen: v7x
topology: tpu7x:2x2x1
jax: 0.10.0
libtpu: 0.0.40
codegen_flags: <defaults>
</compile_context>

<pallas_src>
import functools

import jax
import jax.numpy as jnp
from jax.experimental import pallas as pl
from jax.experimental.pallas import tpu as pltpu

_LANE = 128
_SUBLANE = 8
_MAX_TILE_ROWS = 512  # per-step overhead ~0.35us; 512-row tiles ~ HBM roofline


def _round_up(x, m):
    return (x + m - 1) // m * m


# --------------------------------------------------------------------------
# Kernel: the whole MLP (every Linear + ReLU) fused in one body.
# refs = (x, w1, b1, w2, b2, ..., wN, bN, out); intermediates never leave
# VMEM/vregs.
# --------------------------------------------------------------------------
def _make_fused_mlp_kernel(num_layers):
    def kernel(*refs):
        x_ref = refs[0]
        o_ref = refs[-1]
        p = refs[1:-1]
        h = x_ref[...].astype(jnp.float32)
        for i in range(num_layers):
            w = p[2 * i][...]          # (Din_l, Dout_l), already transposed
            b = p[2 * i + 1][...]      # (1, Dout_l), always f32
            # MXU matmul with f32 accumulation; bias add + ReLU on the VPU in
            # f32 (v5e VPU has no bf16).  ReLU follows EVERY layer, matching
            # the PyTorch module.
            h = jnp.dot(h.astype(w.dtype), w,
                        preferred_element_type=jnp.float32) + b
            h = jnp.maximum(h, 0.0)
        o_ref[...] = h.astype(o_ref.dtype)

    return kernel


# --------------------------------------------------------------------------
# Parameter init (PyTorch nn.Linear default: U[-1/sqrt(fan_in), +1/sqrt(fan_in)])
# --------------------------------------------------------------------------
def init_params(key, num_inputs, hidden_layer_sizes, num_outputs):
    latent_sizes = [num_inputs, *hidden_layer_sizes, num_outputs]
    params = []
    for din, dout in zip(latent_sizes[:-1], latent_sizes[1:]):
        key, kw, kb = jax.random.split(key, 3)
        bound = 1.0 / jnp.sqrt(jnp.float32(din))
        w = jax.random.uniform(kw, (dout, din), jnp.float32, -bound, bound)
        b = jax.random.uniform(kb, (dout,), jnp.float32, -bound, bound)
        params.append((w, b))
    return params


def prepare_params(params, *, param_dtype=jnp.float32):
    """One-time host-side layout prep.

    - weights transposed to (Din, Dout) so the kernel computes x @ W directly
      (no in-kernel XLU transpose);
    - HIDDEN feature dims zero-padded to 128 lanes (lane-dense intermediates);
      the first layer's contraction dim (num_inputs) and the last layer's
      output dim (num_outputs) are left UNPADDED so the wrapper needs no
      input-pad or output-slice ops;
    - padded weight rows/cols and bias entries are exactly 0 and ReLU(0)=0, so
      padded lanes stay zero through every layer;
    - set param_dtype=jnp.bfloat16 if hidden sizes grow (MXU-native); biases
      stay f32 (added on the VPU).
    """
    n = len(params)
    prepped = []
    for li, (w, b) in enumerate(params):
        dout, din = w.shape
        din_p = din if li == 0 else _round_up(din, _LANE)
        dout_p = dout if li == n - 1 else _round_up(dout, _LANE)
        wt = jnp.zeros((din_p, dout_p), jnp.float32).at[:din, :dout].set(w.T)
        bp = jnp.zeros((1, dout_p), jnp.float32).at[0, :dout].set(b)
        prepped.append((wt.astype(param_dtype), bp))
    return prepped


# --------------------------------------------------------------------------
# Batch tiling: multiple-of-8 rows, cap 512, tight fit to avoid dead-row pads,
# and >=2 grid steps whenever there is enough batch to split (v7x megacore).
# --------------------------------------------------------------------------
def _batch_tiling(batch):
    b_eff = _round_up(batch, _SUBLANE)
    if b_eff <= _SUBLANE:
        return b_eff, b_eff                      # one 8-row tile, grid=(1,)
    n_tiles = max(pl.cdiv(b_eff, _MAX_TILE_ROWS), 2)
    tm = _round_up(pl.cdiv(b_eff, n_tiles), _SUBLANE)
    return tm, n_tiles * tm


@functools.partial(jax.jit, static_argnames=("num_outputs",))
def simple_model_forward(x, prepped_params, *, num_outputs):
    B, din = x.shape
    num_layers = len(prepped_params)
    assert prepped_params[-1][0].shape[1] == num_outputs

    tm, b_pad = _batch_tiling(B)

    # Only materialize a batch pad when the tile doesn't divide B (e.g. ragged
    # batches); at the test sizes this is a no-op.
    x_in = x if b_pad == B else jnp.zeros((b_pad, din), x.dtype).at[:B].set(x)

    flat_params = []
    in_specs = [pl.BlockSpec((tm, din), lambda i: (i, 0))]
    for w, b in prepped_params:
        flat_params.extend([w, b])
        # Constant index_maps: weights/biases stay resident in VMEM and are
        # never re-fetched across grid steps.
        in_specs.append(pl.BlockSpec(w.shape, lambda i: (0, 0)))
        in_specs.append(pl.BlockSpec(b.shape, lambda i: (0, 0)))

    out = pl.pallas_call(
        _make_fused_mlp_kernel(num_layers),
        out_shape=jax.ShapeDtypeStruct((b_pad, num_outputs), jnp.float32),
        grid=(b_pad // tm,),
        in_specs=in_specs,
        out_specs=pl.BlockSpec((tm, num_outputs), lambda i: (i, 0)),
        compiler_params=pltpu.CompilerParams(
            # Batch axis is embarrassingly parallel -> megacore / v7x 2-TC split.
            # TODO(synk): if hidden sizes grow past scoped VMEM (16 MiB on
            # v5e), set vmem_limit_bytes here and/or add a K/N grid axis.
            dimension_semantics=("parallel",)),
    )(x_in, *flat_params)

    return out if b_pad == B else out[:B]


# --------------------------------------------------------------------------
# Pure-JAX reference (mirrors the PyTorch module: ReLU after EVERY layer,
# including the final one).
# --------------------------------------------------------------------------
def _reference_forward(x, params):
    latent = x
    for w, b in params:
        latent = jnp.maximum(latent @ w.T + b, 0.0)
    return latent


if __name__ == "__main__":
    # Cartpole-ish sizes: 4 observations, two hidden layers of 32, 2 actions.
    num_inputs, hidden_layer_sizes, num_outputs = 4, [32, 32], 2

    key = jax.random.PRNGKey(0)
    key, kx, kx2 = jax.random.split(key, 3)
    params = init_params(key, num_inputs, hidden_layer_sizes, num_outputs)
    prepped = prepare_params(params)  # one-time layout prep

    # Small batch (single tile, grid=(1,)).
    x = jax.random.normal(kx, (8, num_inputs), dtype=jnp.float32)
    out = jax.block_until_ready(
        simple_model_forward(x, prepped, num_outputs=num_outputs))
    ref = _reference_forward(x, params)
    assert out.shape == (8, num_outputs)
    assert jnp.allclose(out, ref, atol=1e-5, rtol=1e-5)

    # Ragged larger batch (multi-tile grid, exercises the batch-pad path and
    # the >=2-grid-step split used by v7x's two TensorCores).
    x2 = jax.random.normal(kx2, (200, num_inputs), dtype=jnp.float32)
    out2 = jax.block_until_ready(
        simple_model_forward(x2, prepped, num_outputs=num_outputs))
    ref2 = _reference_forward(x2, params)
    assert out2.shape == (200, num_outputs)
    assert jnp.allclose(out2, ref2, atol=1e-5, rtol=1e-5)

    print("KERNEL_OK")
</pallas_src>

<mosaic_0001>
module attributes {stable_mosaic.version = 11 : i64} {
  func.func @kernel(%arg0: i32, %arg1: memref<8x4xf32, #tpu.memory_space<vmem>>, %arg2: memref<4x128xf32, #tpu.memory_space<vmem>>, %arg3: memref<1x128xf32, #tpu.memory_space<vmem>>, %arg4: memref<128x128xf32, #tpu.memory_space<vmem>>, %arg5: memref<1x128xf32, #tpu.memory_space<vmem>>, %arg6: memref<128x2xf32, #tpu.memory_space<vmem>>, %arg7: memref<1x2xf32, #tpu.memory_space<vmem>>, %arg8: memref<8x2xf32, #tpu.memory_space<vmem>>) attributes {dimension_semantics = [#tpu.dimension_semantics<parallel>], iteration_bounds = array<i64: 1>, scalar_prefetch = 0 : i64, scratch_operands = 0 : i64, tpu.core_type = #tpu.core_type<tc>, window_params = [{transform_indices = @transform_0, window_bounds = array<i64: 8, 4>}, {pipeline_mode = #tpu.pipeline_mode<synchronous>, transform_indices = @transform_1, window_bounds = array<i64: 4, 128>}, {pipeline_mode = #tpu.pipeline_mode<synchronous>, transform_indices = @transform_2, window_bounds = array<i64: 1, 128>}, {pipeline_mode = #tpu.pipeline_mode<synchronous>, transform_indices = @transform_3, window_bounds = array<i64: 128, 128>}, {pipeline_mode = #tpu.pipeline_mode<synchronous>, transform_indices = @transform_4, window_bounds = array<i64: 1, 128>}, {pipeline_mode = #tpu.pipeline_mode<synchronous>, transform_indices = @transform_5, window_bounds = array<i64: 128, 2>}, {pipeline_mode = #tpu.pipeline_mode<synchronous>, transform_indices = @transform_6, window_bounds = array<i64: 1, 2>}, {transform_indices = @transform_7, window_bounds = array<i64: 8, 2>}]} {
    %c0 = arith.constant 0 : index
    %c0_0 = arith.constant 0 : index
    %0 = vector.load %arg1[%c0, %c0_0] : memref<8x4xf32, #tpu.memory_space<vmem>>, vector<8x4xf32>
    %c0_1 = arith.constant 0 : index
    %c0_2 = arith.constant 0 : index
    %1 = vector.load %arg2[%c0_1, %c0_2] : memref<4x128xf32, #tpu.memory_space<vmem>>, vector<4x128xf32>
    %c0_3 = arith.constant 0 : index
    %c0_4 = arith.constant 0 : index
    %2 = vector.load %arg3[%c0_3, %c0_4] : memref<1x128xf32, #tpu.memory_space<vmem>>, vector<1x128xf32>
    %cst = arith.constant dense<0.000000e+00> : vector<8x128xf32>
    %3 = tpu.matmul %0, %1, %cst {dimension_numbers = #tpu.dot_dimension_numbers<[1], [0], [0], [1], [0, 0, 1, 1], [], []>} : vector<8x4xf32>, vector<4x128xf32>, vector<8x128xf32> -> vector<8x128xf32>
    %4 = vector.broadcast %2 : vector<1x128xf32> to vector<8x128xf32>
    %5 = arith.addf %3, %4 : vector<8x128xf32>
    %cst_5 = arith.constant 0.000000e+00 : f32
    %6 = vector.broadcast %cst_5 : f32 to vector<8x128xf32>
    %7 = arith.maximumf %5, %6 : vector<8x128xf32>
    %c0_6 = arith.constant 0 : index
    %c0_7 = arith.constant 0 : index
    %8 = vector.load %arg4[%c0_6, %c0_7] : memref<128x128xf32, #tpu.memory_space<vmem>>, vector<128x128xf32>
    %c0_8 = arith.constant 0 : index
    %c0_9 = arith.constant 0 : index
    %9 = vector.load %arg5[%c0_8, %c0_9] : memref<1x128xf32, #tpu.memory_space<vmem>>, vector<1x128xf32>
    %cst_10 = arith.constant dense<0.000000e+00> : vector<8x128xf32>
    %10 = tpu.matmul %7, %8, %cst_10 {dimension_numbers = #tpu.dot_dimension_numbers<[1], [0], [0], [1], [0, 0, 1, 1], [], []>} : vector<8x128xf32>, vector<128x128xf32>, vector<8x128xf32> -> vector<8x128xf32>
    %11 = vector.broadcast %9 : vector<1x128xf32> to vector<8x128xf32>
    %12 = arith.addf %10, %11 : vector<8x128xf32>
    %cst_11 = arith.constant 0.000000e+00 : f32
    %13 = vector.broadcast %cst_11 : f32 to vector<8x128xf32>
    %14 = arith.maximumf %12, %13 : vector<8x128xf32>
    %c0_12 = arith.constant 0 : index
    %c0_13 = arith.constant 0 : index
    %15 = vector.load %arg6[%c0_12, %c0_13] : memref<128x2xf32, #tpu.memory_space<vmem>>, vector<128x2xf32>
    %c0_14 = arith.constant 0 : index
    %c0_15 = arith.constant 0 : index
    %16 = vector.load %arg7[%c0_14, %c0_15] : memref<1x2xf32, #tpu.memory_space<vmem>>, vector<1x2xf32>
    %cst_16 = arith.constant dense<0.000000e+00> : vector<8x2xf32>
    %17 = tpu.matmul %14, %15, %cst_16 {dimension_numbers = #tpu.dot_dimension_numbers<[1], [0], [0], [1], [0, 0, 1, 1], [], []>} : vector<8x128xf32>, vector<128x2xf32>, vector<8x2xf32> -> vector<8x2xf32>
    %18 = vector.broadcast %16 : vector<1x2xf32> to vector<8x2xf32>
    %19 = arith.addf %17, %18 : vector<8x2xf32>
    %cst_17 = arith.constant 0.000000e+00 : f32
    %20 = vector.broadcast %cst_17 : f32 to vector<8x2xf32>
    %21 = arith.maximumf %19, %20 : vector<8x2xf32>
    %c0_18 = arith.constant 0 : index
    %c0_19 = arith.constant 0 : index
    %22 = vector.load %arg8[%c0_18, %c0_19] : memref<8x2xf32, #tpu.memory_space<vmem>>, vector<8x2xf32>
    tpu.vector_store %arg8[%c0_18, %c0_19], %21 {strides = array<i32>} : memref<8x2xf32, #tpu.memory_space<vmem>>, vector<8x2xf32>,
    return
  }
  func.func @transform_0(%arg0: i32) -> (i32, i32) {
    %c0_i32 = arith.constant 0 : i32
    %c0_i32_0 = arith.constant 0 : i32
    return %arg0, %c0_i32 : i32, i32
  }
  func.func @transform_1(%arg0: i32) -> (i32, i32) {
    %c0_i32 = arith.constant 0 : i32
    %c0_i32_0 = arith.constant 0 : i32
    %c0_i32_1 = arith.constant 0 : i32
    return %c0_i32, %c0_i32_0 : i32, i32
  }
  func.func @transform_2(%arg0: i32) -> (i32, i32) {
    %c0_i32 = arith.constant 0 : i32
    %c0_i32_0 = arith.constant 0 : i32
    %c0_i32_1 = arith.constant 0 : i32
    return %c0_i32, %c0_i32_0 : i32, i32
  }
  func.func @transform_3(%arg0: i32) -> (i32, i32) {
    %c0_i32 = arith.constant 0 : i32
    %c0_i32_0 = arith.constant 0 : i32
    %c0_i32_1 = arith.constant 0 : i32
    return %c0_i32, %c0_i32_0 : i32, i32
  }
  func.func @transform_4(%arg0: i32) -> (i32, i32) {
    %c0_i32 = arith.constant 0 : i32
    %c0_i32_0 = arith.constant 0 : i32
    %c0_i32_1 = arith.constant 0 : i32
    return %c0_i32, %c0_i32_0 : i32, i32
  }
  func.func @transform_5(%arg0: i32) -> (i32, i32) {
    %c0_i32 = arith.constant 0 : i32
    %c0_i32_0 = arith.constant 0 : i32
    %c0_i32_1 = arith.constant 0 : i32
    return %c0_i32, %c0_i32_0 : i32, i32
  }
  func.func @transform_6(%arg0: i32) -> (i32, i32) {
    %c0_i32 = arith.constant 0 : i32
    %c0_i32_0 = arith.constant 0 : i32
    %c0_i32_1 = arith.constant 0 : i32
    return %c0_i32, %c0_i32_0 : i32, i32
  }
  func.func @transform_7(%arg0: i32) -> (i32, i32) {
    %c0_i32 = arith.constant 0 : i32
    %c0_i32_0 = arith.constant 0 : i32
    return %arg0, %c0_i32 : i32, i32
  }
}

</mosaic_0001>

<bundles_post_ra>
// kernel: simple_model_forward.1
= control target key start
LH: loop header
LB: loop body
LE: loop exit
PB: predicated region body
PF: predicated region fallthrough
CT: control target
= control target key end

     0   :  { %vm39_vm0 = vcmask 1043456   ;;  %vm35_vm1 = vcmask 31744   ;;  %v475_v0 = vmov 0.0   ;;  %vm476_vm2 = vmmov 0   ;;  %s648_s1 = inlined_call_operand.vmem [shape: f32[4,128], index: 1, kind: input, shape index: {}]   ;;  %s649_s0 = inlined_call_operand.vmem [shape: f32[8,4], index: 0, kind: input, shape index: {}]   ;;  %s650_s3 = inlined_call_operand.vmem [shape: f32[128,128], index: 3, kind: input, shape index: {}]   ;;  %s651_s5 = inlined_call_operand.vmem [shape: f32[128,2], index: 5, kind: input, shape index: {}]   ;;  %s652_s2 = inlined_call_operand.vmem [shape: f32[1,128], index: 2, kind: input, shape index: {}]   ;;  %s653_s4 = inlined_call_operand.vmem [shape: f32[1,128], index: 4, kind: input, shape index: {}]   ;;  %s654_s6 = inlined_call_operand.vmem [shape: f32[1,2], index: 6, kind: input, shape index: {}]   ;;  %s655_s7 = inlined_call_operand.vmem [shape: f32[8,2], index: 7, kind: output, shape index: {}]  }
   0x1   :  { %349 = vmatprep.subr.mxu0 %v475_v0  ;;  %v27_v1 = vld [vmem:[%s648_s1] sm:$0xf]  ;;  %351 = vmatprep.mubr.msk.f32.mxu0 %vm476_vm2, %v475_v0  ;;  %v477_v4 = vmov 0.0|0.0   ;;  %v115_v5 = vld [vmem:[%s650_s3 + $0x8] sm:$0xff]  ;;  %v116_v6 = vld [vmem:[%s650_s3 + $0x10] sm:$0xff]  ;;  %vm302_vm3 = vcmask 15360  }
   0x2   :  { %v26_v2 = vld [vmem:[%s649_s0] sm:$0xff]  ;;  %350 = vmatpush3.msk.msra.mxu0 %vm39_vm0, %v27_v1  ;;  %424 = vmatprep.subr.bf16.mxu1 %v477_v4  ;;  %v117_v7 = vld [vmem:[%s650_s3 + $0x18] sm:$0xff]  ;;  %v119_v11 = vld [vmem:[%s650_s3 + $0x28] sm:$0xff] }
   0x3   :  { %v114_v3 = vld [vmem:[%s650_s3] sm:$0xff]  ;;  %352 = vmatmul.mubr.msk.f32.vlgmr.msra.gmra.mrb[0].mxu0 %vm35_vm1, %v26_v2  ;;  %386 = vmatprep.mubr.msk.f32.mxu1 %vm476_vm2, %v475_v0  ;;  %v428_v9 = vpack.c.bf16 %v117_v7, %v116_v6  ;;  %v120_v13 = vld [vmem:[%s650_s3 + $0x30] sm:$0xff]  ;;  %v121_v14 = vld [vmem:[%s650_s3 + $0x38] sm:$0xff] }
   0x4   :  { %v425_v8 = vpack.c.bf16 %v115_v5, %v114_v3  ;;  %448 = vmatprep.subr.bf16.mxu0 %v477_v4  ;;  %421 = vmatprep.mubr.msk.f32.mxu0 %vm476_vm2, %v475_v0  ;;  %v118_v10 = vld [vmem:[%s650_s3 + $0x20] sm:$0xff]  ;;  %v434_v15 = vpack.c.bf16 %v121_v14, %v120_v13  ;;  %v123_v17 = vld [vmem:[%s650_s3 + $0x48] sm:$0xff]  ;;  %v124_v19 = vld [vmem:[%s650_s3 + $0x50] sm:$0xff] }
   0x5   :  { %v431_v12 = vpack.c.bf16 %v119_v11, %v118_v10  ;;  %v122_v16 = vld [vmem:[%s650_s3 + $0x40] sm:$0xff]  ;;  %v125_v20 = vld [vmem:[%s650_s3 + $0x58] sm:$0xff]  ;;  %v127_v23 = vld [vmem:[%s650_s3 + $0x68] sm:$0xff] }
   0x6   :  { %426 = vmatpush3.bf16.msra.mxu1 %v425_v8  ;;  %v437_v18 = vpack.c.bf16 %v123_v17, %v122_v16  ;;  %v440_v21 = vpack.c.bf16 %v125_v20, %v124_v19  ;;  %v126_v22 = vld [vmem:[%s650_s3 + $0x60] sm:$0xff]  ;;  %v128_v25 = vld [vmem:[%s650_s3 + $0x70] sm:$0xff]  ;;  %v129_v26 = vld [vmem:[%s650_s3 + $0x78] sm:$0xff] }
   0x7   :  { %427 = vmatprep.subr.bf16.mxu1 %v477_v4  ;;  %v443_v24 = vpack.c.bf16 %v127_v23, %v126_v22  ;;  %v446_v27 = vpack.c.bf16 %v129_v26, %v128_v25  ;;  %v208_v28 = vld [vmem:[%s651_s5] sm:$0xff]  ;;  %v209_v29 = vld [vmem:[%s651_s5 + $0x8] sm:$0xff]  ;;  %v210_v30 = vld [vmem:[%s651_s5 + $0x10] sm:$0xff] }
   0x8   :  { %v449_v31 = vpack.c.bf16 %v209_v29, %v208_v28  ;;  %v211_v32 = vld [vmem:[%s651_s5 + $0x18] sm:$0xff]  ;;  %v212_v34 = vld [vmem:[%s651_s5 + $0x20] sm:$0xff]  ;;  %v213_v35 = vld [vmem:[%s651_s5 + $0x28] sm:$0xff] }
   0x9   :  { %v452_v33 = vpack.c.bf16 %v211_v32, %v210_v30  ;;  %v455_v36 = vpack.c.bf16 %v213_v35, %v212_v34  ;;  %v214_v37 = vld [vmem:[%s651_s5 + $0x30] sm:$0xff]  ;;  %v215_v38 = vld [vmem:[%s651_s5 + $0x38] sm:$0xff]  ;;  %v216_v40 = vld [vmem:[%s651_s5 + $0x40] sm:$0xff] }
   0xa   :  { %429 = vmatpush3.bf16.msra.mxu1 %v428_v9  ;;  %450 = vmatpush3.bf16.msra.mxu0 %v449_v31  ;;  %v458_v39 = vpack.c.bf16 %v215_v38, %v214_v37  ;;  %v217_v41 = vld [vmem:[%s651_s5 + $0x48] sm:$0xff]  ;;  %v218_v43 = vld [vmem:[%s651_s5 + $0x50] sm:$0xff]  ;;  %v219_v44 = vld [vmem:[%s651_s5 + $0x58] sm:$0xff] }
   0xb   :  { %430 = vmatprep.subr.bf16.mxu1 %v477_v4  ;;  %451 = vmatprep.subr.bf16.mxu0 %v477_v4  ;;  %v461_v42 = vpack.c.bf16 %v217_v41, %v216_v40  ;;  %v464_v45 = vpack.c.bf16 %v219_v44, %v218_v43  ;;  %v220_v46 = vld [vmem:[%s651_s5 + $0x60] sm:$0xff]  ;;  %v221_v47 = vld [vmem:[%s651_s5 + $0x68] sm:$0xff]  ;;  %v222_v54 = vld [vmem:[%s651_s5 + $0x70] sm:$0xff] }
   0xc   :  { %v467_v48 = vpack.c.bf16 %v221_v47, %v220_v46  ;;  %v308_v49 = vld [vmem:[%s652_s2] ss:$0 sm:$0xff]  ;;  %v223_v55 = vld [vmem:[%s651_s5 + $0x78] sm:$0xff] }
   0xd   :  { %v470_v56 = vpack.c.bf16 %v223_v55, %v222_v54  ;;  %v311_v57 = vld [vmem:[%s653_s4] ss:$0 sm:$0xff] }
   0xe   :  { %432 = vmatpush3.bf16.msra.mxu1 %v431_v12  ;;  %453 = vmatpush3.bf16.msra.mxu0 %v452_v33  ;;  %v312_v62 = vld [vmem:[%s654_s6] ss:$0 sm:$0xff] }
   0xf   :  { %433 = vmatprep.subr.bf16.mxu1 %v477_v4  ;;  %454 = vmatprep.subr.bf16.mxu0 %v477_v4 }
  0x12   :  { %435 = vmatpush3.bf16.msra.mxu1 %v434_v15  ;;  %456 = vmatpush3.bf16.msra.mxu0 %v455_v36 }
  0x13   :  { %436 = vmatprep.subr.bf16.mxu1 %v477_v4  ;;  %457 = vmatprep.subr.bf16.mxu0 %v477_v4 }
  0x16   :  { %438 = vmatpush3.bf16.msra.mxu1 %v437_v18  ;;  %459 = vmatpush3.bf16.msra.mxu0 %v458_v39 }
  0x17   :  { %439 = vmatprep.subr.bf16.mxu1 %v477_v4  ;;  %460 = vmatprep.subr.bf16.mxu0 %v477_v4 }
  0x1a   :  { %441 = vmatpush3.bf16.msra.mxu1 %v440_v21  ;;  %462 = vmatpush3.bf16.msra.mxu0 %v461_v42 }
  0x1b   :  { %442 = vmatprep.subr.bf16.mxu1 %v477_v4  ;;  %463 = vmatprep.subr.bf16.mxu0 %v477_v4 }
  0x1e   :  { %444 = vmatpush3.bf16.msra.mxu1 %v443_v24  ;;  %465 = vmatpush3.bf16.msra.mxu0 %v464_v45 }
  0x1f   :  { %445 = vmatprep.subr.bf16.mxu1 %v477_v4  ;;  %466 = vmatprep.subr.bf16.mxu0 %v477_v4 }
  0x22   :  { %447 = vmatpush3.bf16.msra.mxu1 %v446_v27  ;;  %468 = vmatpush3.bf16.msra.mxu0 %v467_v48 }
  0x23   :  { %469 = vmatprep.subr.bf16.mxu0 %v477_v4 }
  0x26   :  { %471 = vmatpush3.bf16.msra.mxu0 %v470_v56 }
  0xd6   :  { %v109_v50 = vpop.f32.mrb[0].mxu0 }
  0xd7   :  { %v110_v51 = vadd.f32 %v308_v49, %v109_v50  ;;  %v353_v52 = vpop.f32.mrb[1].mxu0 }
  0xd9   :  { %v113_v53 = vmax.f32 %v110_v51, 0.0 }
  0xdb   :  { %387 = vmatmul.mubr.f32.vlgmr.msra.gmra.mrb[0].mxu1 %v113_v53 }
 0x1ae   :  { %v203_v58 = vpop.f32.mrb[0].mxu1 }
 0x1af   :  { %v204_v59 = vadd.f32 %v311_v57, %v203_v58  ;;  %v388_v60 = vpop.f32.mrb[1].mxu1 }
 0x1b1   :  { %v207_v61 = vmax.f32 %v204_v59, 0.0 }
 0x1b3   :  { %422 = vmatmul.mubr.f32.vlgmr.msra.gmra.mrb[2].mxu0 %v207_v61 }
 0x286   :  { %v297_v63 = vpop.f32.mrb[2].mxu0 }
 0x287   :  { %v298_v0 = vadd.f32 %v312_v62, %v297_v63  ;;  %v423_v1 = vpop.f32.mrb[3].mxu0 }
 0x289   :  { %v301_v2 = vmax.f32 %v298_v0, 0.0 }
 0x28b   :  { %303 = vst.msk [vmem:[%s655_s7] sm:$0xff] %vm302_vm3, %v301_v2 }

</bundles_post_ra>
